<compile_context>
chip_gen: v6e
topology: v6e:2x2x1
jax: 0.10.0
libtpu: 0.0.40
codegen_flags: <defaults>
</compile_context>

<pallas_src>
import functools

import jax
import jax.numpy as jnp
from jax import lax
from jax.experimental import pallas as pl
from jax.experimental.pallas import tpu as pltpu


# MXU operand dtype. Keep f32 here to preserve the 1e-4 check vs. the f32
# reference; switch to jnp.bfloat16 on v6e/v7x for higher MXU throughput.
MXU_DTYPE = jnp.float32


def _round_up(x, m):
    return (x + m - 1) // m * m


def _choose_t_block(T, b_pad, h_pad, o_pad, budget_bytes=8 << 20):
    """Pick timesteps-per-block so double-buffered blocks fit a VMEM budget."""
    # double-buffered gi block + double-buffered out block + h-block scratch
    bytes_per_step = b_pad * (2 * 3 * h_pad + 2 * max(h_pad, o_pad) + h_pad) * 4
    t_max = max(1, budget_bytes // bytes_per_step)
    return max(1, min(T, t_max, 128))


# ----------------------------------------------------------------------------
# Kernel 1: whole-sequence input projection (hoisted out of the recurrence).
#   gi = x @ W_ih_cat + b  with W_ih_cat: (D, 3*Hp)  -> one wide MXU pass.
# ----------------------------------------------------------------------------
def _input_proj_kernel(x_ref, w_ref, b_ref, gi_ref):
    gi_ref[...] = (
        jnp.dot(x_ref[...].astype(MXU_DTYPE), w_ref[...].astype(MXU_DTYPE),
                preferred_element_type=jnp.float32)
        + b_ref[...])


def input_projection(x_flat, w_cat, b_cat, *, row_block):
    """x_flat: (N, D); w_cat: (D, 3*Hp); b_cat: (1, 3*Hp) -> (N, 3*Hp)."""
    N, D = x_flat.shape
    G = w_cat.shape[1]
    assert N % row_block == 0, (N, row_block)
    return pl.pallas_call(
        _input_proj_kernel,
        out_shape=jax.ShapeDtypeStruct((N, G), jnp.float32),
        grid_spec=pltpu.PrefetchScalarGridSpec(
            num_scalar_prefetch=0,
            grid=(N // row_block,),
            in_specs=[
                pl.BlockSpec((row_block, D), lambda i: (i, 0)),
                pl.BlockSpec((D, G), lambda i: (0, 0)),
                pl.BlockSpec((1, G), lambda i: (0, 0)),
            ],
            out_specs=pl.BlockSpec((row_block, G), lambda i: (i, 0)),
        ),
        compiler_params=pltpu.CompilerParams(
            dimension_semantics=("parallel",)),
    )(x_flat, w_cat, b_cat)


# ----------------------------------------------------------------------------
# Kernel 2: GRU recurrence. One grid step == t_block timesteps; hidden state
# carried in a VMEM scratch across grid steps. One fused MXU matmul per step.
# ----------------------------------------------------------------------------
def _gru_cell(h, gi_t, w_hh_cat, bhn, h_pad):
    gh = jnp.dot(h.astype(MXU_DTYPE), w_hh_cat,
                 preferred_element_type=jnp.float32)            # (Bp, 3*Hp)
    rz = jax.nn.sigmoid(gi_t[:, :2 * h_pad] + gh[:, :2 * h_pad])
    r = rz[:, :h_pad]
    z = rz[:, h_pad:]
    n = jnp.tanh(gi_t[:, 2 * h_pad:] + r * (gh[:, 2 * h_pad:] + bhn))
    return n + z * (h - n)                                      # == (1-z)*n + z*h


def _gru_seq_kernel(gi_ref, whh_ref, bhn_ref, out_ref, h_scratch,
                    *, t_block, b_pad, h_pad):
    @pl.when(pl.program_id(0) == 0)
    def _():
        h_scratch[...] = jnp.zeros_like(h_scratch)

    w_hh = whh_ref[...].astype(MXU_DTYPE)                       # hoisted
    bhn = jnp.broadcast_to(bhn_ref[...], (b_pad, h_pad))        # hoisted

    def step(tt, h):
        row = pl.multiple_of(tt * b_pad, b_pad)
        gi_t = gi_ref[pl.ds(row, b_pad), :]
        h_new = _gru_cell(h, gi_t, w_hh, bhn, h_pad)
        out_ref[pl.ds(row, b_pad), :] = h_new
        return h_new

    h_scratch[...] = lax.fori_loop(0, t_block, step, h_scratch[...],
                                   unroll=min(t_block, 8))


def _gru_seq_proj_kernel(gi_ref, whh_ref, bhn_ref, wc_ref, bc_ref,
                         out_ref, h_scratch, hblk_scratch,
                         *, t_block, b_pad, h_pad):
    """Last layer: same recurrence; 1x1 conv done once in the block epilogue."""
    @pl.when(pl.program_id(0) == 0)
    def _():
        h_scratch[...] = jnp.zeros_like(h_scratch)

    w_hh = whh_ref[...].astype(MXU_DTYPE)
    bhn = jnp.broadcast_to(bhn_ref[...], (b_pad, h_pad))

    def step(tt, h):
        row = pl.multiple_of(tt * b_pad, b_pad)
        gi_t = gi_ref[pl.ds(row, b_pad), :]
        h_new = _gru_cell(h, gi_t, w_hh, bhn, h_pad)
        hblk_scratch[pl.ds(row, b_pad), :] = h_new
        return h_new

    h_scratch[...] = lax.fori_loop(0, t_block, step, h_scratch[...],
                                   unroll=min(t_block, 8))

    # Epilogue: one batched (t_block*Bp, Hp) @ (Hp, Op) matmul + bias, one
    # lane-dense writeback (O padded to 128 lanes).
    out_ref[...] = (
        jnp.dot(hblk_scratch[...].astype(MXU_DTYPE),
                wc_ref[...].astype(MXU_DTYPE),
                preferred_element_type=jnp.float32)
        + bc_ref[...])


def gru_recurrence(gi, w_hh_cat, b_hn, *, t_block, b_pad, h_pad):
    """gi: (T_pad*Bp, 3*Hp) -> hidden states (T_pad*Bp, Hp), time-major flat."""
    N = gi.shape[0]
    rows = t_block * b_pad
    assert N % rows == 0, (N, rows)
    kernel = functools.partial(_gru_seq_kernel, t_block=t_block,
                               b_pad=b_pad, h_pad=h_pad)
    return pl.pallas_call(
        kernel,
        out_shape=jax.ShapeDtypeStruct((N, h_pad), jnp.float32),
        grid_spec=pltpu.PrefetchScalarGridSpec(
            num_scalar_prefetch=0,
            grid=(N // rows,),
            in_specs=[
                pl.BlockSpec((rows, 3 * h_pad), lambda i: (i, 0)),
                pl.BlockSpec((h_pad, 3 * h_pad), lambda i: (0, 0)),
                pl.BlockSpec((1, h_pad), lambda i: (0, 0)),
            ],
            out_specs=pl.BlockSpec((rows, h_pad), lambda i: (i, 0)),
            scratch_shapes=[pltpu.VMEM((b_pad, h_pad), jnp.float32)],
        ),
        compiler_params=pltpu.CompilerParams(
            dimension_semantics=("arbitrary",)),   # sequential recurrence
    )(gi, w_hh_cat, b_hn)


def gru_recurrence_fused_conv(gi, w_hh_cat, b_hn, wc, bc, *,
                              t_block, b_pad, h_pad, o_pad):
    """Last-layer recurrence with fused 1x1-conv epilogue; (T_pad*Bp, Op)."""
    N = gi.shape[0]
    rows = t_block * b_pad
    assert N % rows == 0, (N, rows)
    kernel = functools.partial(_gru_seq_proj_kernel, t_block=t_block,
                               b_pad=b_pad, h_pad=h_pad)
    return pl.pallas_call(
        kernel,
        out_shape=jax.ShapeDtypeStruct((N, o_pad), jnp.float32),
        grid_spec=pltpu.PrefetchScalarGridSpec(
            num_scalar_prefetch=0,
            grid=(N // rows,),
            in_specs=[
                pl.BlockSpec((rows, 3 * h_pad), lambda i: (i, 0)),
                pl.BlockSpec((h_pad, 3 * h_pad), lambda i: (0, 0)),
                pl.BlockSpec((1, h_pad), lambda i: (0, 0)),
                pl.BlockSpec((h_pad, o_pad), lambda i: (0, 0)),
                pl.BlockSpec((1, o_pad), lambda i: (0, 0)),
            ],
            out_specs=pl.BlockSpec((rows, o_pad), lambda i: (i, 0)),
            scratch_shapes=[pltpu.VMEM((b_pad, h_pad), jnp.float32),
                            pltpu.VMEM((rows, h_pad), jnp.float32)],
        ),
        compiler_params=pltpu.CompilerParams(
            dimension_semantics=("arbitrary",)),
    )(gi, w_hh_cat, b_hn, wc, bc)


# ----------------------------------------------------------------------------
# Weight preparation (PyTorch layout -> fused, lane-padded operands).
# ----------------------------------------------------------------------------
def _prep_gru_weights(w_ih, w_hh, b_ih, b_hh, d_pad, h_pad):
    """(3H,D)/(3H,H)/(3H,)/(3H,) -> (Dp,3Hp), (Hp,3Hp), (1,3Hp), (1,Hp)."""
    H = w_hh.shape[1]
    D = w_ih.shape[1]
    w_ih_g = jnp.transpose(w_ih.reshape(3, H, D), (0, 2, 1))     # (3, D, H)
    w_hh_g = jnp.transpose(w_hh.reshape(3, H, H), (0, 2, 1))     # (3, H, H)
    w_ih_g = jnp.pad(w_ih_g, ((0, 0), (0, d_pad - D), (0, h_pad - H)))
    w_hh_g = jnp.pad(w_hh_g, ((0, 0), (0, h_pad - H), (0, h_pad - H)))
    w_ih_cat = jnp.transpose(w_ih_g, (1, 0, 2)).reshape(d_pad, 3 * h_pad)
    w_hh_cat = jnp.transpose(w_hh_g, (1, 0, 2)).reshape(h_pad, 3 * h_pad)
    b_ih_g = jnp.pad(b_ih.reshape(3, H), ((0, 0), (0, h_pad - H)))
    b_hh_g = jnp.pad(b_hh.reshape(3, H), ((0, 0), (0, h_pad - H)))
    # Fold b_hr/b_hz into the input-projection bias; keep b_hn separate
    # (it must stay inside the r * (W_hn h + b_hn) term).
    fold = jnp.array([1.0, 1.0, 0.0], jnp.float32)[:, None]
    b_gi = (b_ih_g + fold * b_hh_g).reshape(1, 3 * h_pad)
    b_hn = b_hh_g[2].reshape(1, h_pad)
    return w_ih_cat, w_hh_cat, b_gi, b_hn


# ----------------------------------------------------------------------------
# Full module forward.
# ----------------------------------------------------------------------------
def nnet_rnn_forward(inputs_btd, lengths, params):
    """inputs_btd: (B, T, D_in) float32, lengths: (B,) int32 -> (B, T, out)."""
    B, T, D_in = inputs_btd.shape
    H = params["gru_layers"][0][1].shape[1]
    O = params["conv_w"].shape[0]

    h_pad = _round_up(H, 128)
    o_pad = _round_up(O, 128)
    b_pad = _round_up(B, 8)
    t_block = _choose_t_block(T, b_pad, h_pad, o_pad)
    t_pad = _round_up(T, t_block)
    rows_per_blk = t_block * b_pad

    # Time-major, zero-pad batch (sublanes) and time (block multiple), flatten.
    x_tm = jnp.transpose(inputs_btd.astype(jnp.float32), (1, 0, 2))   # (T,B,D)
    x_tm = jnp.pad(x_tm, ((0, t_pad - T), (0, b_pad - B), (0, 0)))
    x_cur = x_tm.reshape(t_pad * b_pad, D_in)
    N = x_cur.shape[0]

    # 1x1 conv as (Hp, Op) matmul + bias, zero-padded to full lanes.
    conv_w = params["conv_w"]
    wc = jnp.pad(jnp.transpose(conv_w.reshape(O, H)),
                 ((0, h_pad - H), (0, o_pad - O)))
    bc = jnp.pad(params["conv_b"].reshape(1, O), ((0, 0), (0, o_pad - O)))

    # Bigger row blocks for the (parallel) input projection when T is long.
    proj_rows = rows_per_blk
    while proj_rows * 2 <= min(N, 2048) and N % (proj_rows * 2) == 0:
        proj_rows *= 2

    n_layers = len(params["gru_layers"])
    y_flat = None
    for li, (w_ih, w_hh, b_ih, b_hh) in enumerate(params["gru_layers"]):
        d_cur = x_cur.shape[1]
        w_ih_cat, w_hh_cat, b_gi, b_hn = _prep_gru_weights(
            w_ih, w_hh, b_ih, b_hh, d_cur, h_pad)
        # (1) hoisted whole-sequence input projection (one wide MXU matmul).
        gi = input_projection(x_cur, w_ih_cat, b_gi, row_block=proj_rows)
        # (2) sequential recurrence; last layer fuses the 1x1 conv epilogue.
        if li + 1 < n_layers:
            x_cur = gru_recurrence(gi, w_hh_cat, b_hn, t_block=t_block,
                                   b_pad=b_pad, h_pad=h_pad)
            # dropout between layers: identity in eval mode
        else:
            y_flat = gru_recurrence_fused_conv(gi, w_hh_cat, b_hn, wc, bc,
                                               t_block=t_block, b_pad=b_pad,
                                               h_pad=h_pad, o_pad=o_pad)

    # Slice off batch/time/lane padding, then apply pack/pad_packed semantics:
    # valid positions match PyTorch by causality (valid steps never consume
    # padded-step state); positions t >= lengths[b] become conv(0) = conv bias.
    y_tm = y_flat.reshape(t_pad, b_pad, o_pad)[:T, :B, :O]
    mask = (jnp.arange(T, dtype=jnp.int32)[:, None]
            < lengths.astype(jnp.int32)[None, :])
    y_tm = jnp.where(mask[:, :, None], y_tm, params["conv_b"][None, None, :])
    return jnp.transpose(y_tm, (1, 0, 2))                        # (B, T, O)


# ----------------------------------------------------------------------------
# Pure-JAX reference (PyTorch pack_padded semantics, for correctness check).
# ----------------------------------------------------------------------------
def _gru_ref(x_btd, lengths, w_ih, w_hh, b_ih, b_hh):
    B, T, _ = x_btd.shape
    H = w_hh.shape[1]

    def step(h, xt):
        gi = xt @ w_ih.T + b_ih
        gh = h @ w_hh.T + b_hh
        r = jax.nn.sigmoid(gi[:, :H] + gh[:, :H])
        z = jax.nn.sigmoid(gi[:, H:2 * H] + gh[:, H:2 * H])
        n = jnp.tanh(gi[:, 2 * H:] + r * gh[:, 2 * H:])
        h_new = (1.0 - z) * n + z * h
        return h_new, h_new

    xs = jnp.transpose(x_btd, (1, 0, 2))
    _, hs = lax.scan(step, jnp.zeros((B, H), jnp.float32), xs)
    hs = jnp.transpose(hs, (1, 0, 2))                            # (B, T, H)
    mask = (jnp.arange(T)[None, :] < lengths[:, None])[..., None]
    return jnp.where(mask, hs, 0.0)


def _ref_forward(inputs_btd, lengths, params):
    x = inputs_btd.astype(jnp.float32)
    for (w_ih, w_hh, b_ih, b_hh) in params["gru_layers"]:
        x = _gru_ref(x, lengths, w_ih, w_hh, b_ih, b_hh)
    O, H = params["conv_w"].shape[0], params["conv_w"].shape[1]
    w = params["conv_w"].reshape(O, H)
    return jnp.einsum("bth,oh->bto", x, w) + params["conv_b"][None, None, :]


# ----------------------------------------------------------------------------
if __name__ == "__main__":
    # Module hyperparameters (small, consistent with nnetRNN.__init__).
    input_size, num_layers, hidden_size, out_size = 12, 2, 32, 10
    B, T = 2, 8

    key = jax.random.PRNGKey(0)
    keys = iter(jax.random.split(key, 4 * num_layers + 4))

    in_sizes = [input_size] + [hidden_size] * (num_layers - 1)
    gru_layers = []
    for lin in in_sizes:
        w_ih = 0.1 * jax.random.normal(next(keys), (3 * hidden_size, lin), jnp.float32)
        w_hh = 0.1 * jax.random.normal(next(keys), (3 * hidden_size, hidden_size), jnp.float32)
        b_ih = 0.1 * jax.random.normal(next(keys), (3 * hidden_size,), jnp.float32)
        b_hh = 0.1 * jax.random.normal(next(keys), (3 * hidden_size,), jnp.float32)
        gru_layers.append((w_ih, w_hh, b_ih, b_hh))

    conv_w = 0.1 * jax.random.normal(next(keys), (out_size, hidden_size, 1), jnp.float32)
    conv_b = 0.1 * jax.random.normal(next(keys), (out_size,), jnp.float32)
    params = {"gru_layers": gru_layers, "conv_w": conv_w, "conv_b": conv_b}

    inputs = jax.random.normal(next(keys), (B, T, input_size), jnp.float32)
    lengths = jnp.array([8, 5], dtype=jnp.int32)   # sorted descending (packed-seq style)

    out = nnet_rnn_forward(inputs, lengths, params)
    out = jax.block_until_ready(out)

    ref = jax.block_until_ready(_ref_forward(inputs, lengths, params))
    assert out.shape == (B, T, out_size), out.shape
    assert jnp.allclose(out, ref, atol=1e-4, rtol=1e-4), float(jnp.abs(out - ref).max())

    print("KERNEL_OK")
</pallas_src>

<mosaic_0001>
module attributes {stable_mosaic.version = 11 : i64} {
  func.func @_input_proj_kernel(%arg0: i32, %arg1: memref<64x12xf32, #tpu.memory_space<vmem>>, %arg2: memref<12x384xf32, #tpu.memory_space<vmem>>, %arg3: memref<1x384xf32, #tpu.memory_space<vmem>>, %arg4: memref<64x384xf32, #tpu.memory_space<vmem>>) attributes {dimension_semantics = [#tpu.dimension_semantics<parallel>], iteration_bounds = array<i64: 1>, scalar_prefetch = 0 : i64, scratch_operands = 0 : i64, tpu.core_type = #tpu.core_type<tc>, window_params = [{transform_indices = @transform_0, window_bounds = array<i64: 64, 12>}, {pipeline_mode = #tpu.pipeline_mode<synchronous>, transform_indices = @transform_1, window_bounds = array<i64: 12, 384>}, {pipeline_mode = #tpu.pipeline_mode<synchronous>, transform_indices = @transform_2, window_bounds = array<i64: 1, 384>}, {transform_indices = @transform_3, window_bounds = array<i64: 64, 384>}]} {
    %c0 = arith.constant 0 : index
    %c0_0 = arith.constant 0 : index
    %0 = vector.load %arg1[%c0, %c0_0] : memref<64x12xf32, #tpu.memory_space<vmem>>, vector<64x12xf32>
    %c0_1 = arith.constant 0 : index
    %c0_2 = arith.constant 0 : index
    %1 = vector.load %arg2[%c0_1, %c0_2] : memref<12x384xf32, #tpu.memory_space<vmem>>, vector<12x384xf32>
    %cst = arith.constant dense<0.000000e+00> : vector<64x384xf32>
    %2 = tpu.matmul %0, %1, %cst {dimension_numbers = #tpu.dot_dimension_numbers<[1], [0], [0], [1], [0, 0, 1, 1], [], []>} : vector<64x12xf32>, vector<12x384xf32>, vector<64x384xf32> -> vector<64x384xf32>
    %c0_3 = arith.constant 0 : index
    %c0_4 = arith.constant 0 : index
    %3 = vector.load %arg3[%c0_3, %c0_4] : memref<1x384xf32, #tpu.memory_space<vmem>>, vector<1x384xf32>
    %4 = vector.broadcast %3 : vector<1x384xf32> to vector<64x384xf32>
    %5 = arith.addf %2, %4 : vector<64x384xf32>
    %c0_5 = arith.constant 0 : index
    %c0_6 = arith.constant 0 : index
    %6 = vector.load %arg4[%c0_5, %c0_6] : memref<64x384xf32, #tpu.memory_space<vmem>>, vector<64x384xf32>
    tpu.vector_store %arg4[%c0_5, %c0_6], %5 {strides = array<i32>} : memref<64x384xf32, #tpu.memory_space<vmem>>, vector<64x384xf32>,
    return
  }
  func.func @transform_0(%arg0: i32) -> (i32, i32) {
    %c0_i32 = arith.constant 0 : i32
    %c0_i32_0 = arith.constant 0 : i32
    return %arg0, %c0_i32 : i32, i32
  }
  func.func @transform_1(%arg0: i32) -> (i32, i32) {
    %c0_i32 = arith.constant 0 : i32
    %c0_i32_0 = arith.constant 0 : i32
    %c0_i32_1 = arith.constant 0 : i32
    return %c0_i32, %c0_i32_0 : i32, i32
  }
  func.func @transform_2(%arg0: i32) -> (i32, i32) {
    %c0_i32 = arith.constant 0 : i32
    %c0_i32_0 = arith.constant 0 : i32
    %c0_i32_1 = arith.constant 0 : i32
    return %c0_i32, %c0_i32_0 : i32, i32
  }
  func.func @transform_3(%arg0: i32) -> (i32, i32) {
    %c0_i32 = arith.constant 0 : i32
    %c0_i32_0 = arith.constant 0 : i32
    return %arg0, %c0_i32 : i32, i32
  }
}

</mosaic_0001>

<bundles_post_ra>
// kernel: tpu_custom_call.1
= control target key start
LH: loop header
LB: loop body
LE: loop exit
PB: predicated region body
PF: predicated region fallthrough
CT: control target
= control target key end

     0   :  { %vm71_vm0 = vcmask 1043456   ;;  %vm46_vm1 = vcmask 97280   ;;  %v414_v7 = vmov 0.0   ;;  %s528_s0 = inlined_call_operand.vmem [shape: f32[64,12], index: 0, kind: input, shape index: {}]   ;;  %s529_s1 = inlined_call_operand.vmem [shape: f32[12,384], index: 1, kind: input, shape index: {}]   ;;  %s530_s2 = inlined_call_operand.vmem [shape: f32[1,384], index: 2, kind: input, shape index: {}]   ;;  %s531_s3 = inlined_call_operand.hbm [shape: f32[64,384], index: 3, kind: output, shape index: {}]  }
   0x1   :  { %v27_v0 = vld [vmem:[%s529_s1 + $0x20] sm:$0xf]  ;;  %v26_v1 = vld [vmem:[%s529_s1 + $0x18] sm:$0xf]  ;;  %v24_v2 = vld [vmem:[%s529_s1 + $0x8] sm:$0xff]  ;;  %145 = vmatprep.mubr.f32.mxu0 %v414_v7  ;;  %181 = vmatprep.mubr.f32.mxu1 %v414_v7 }
   0x2   :  { %339 = vmatprep.subr.msk.mxu0 %vm71_vm0, %v27_v0  ;;  %384 = vmatprep.subr.msk.mxu1 %vm71_vm0, %v27_v0  ;;  %v23_v3 = vld [vmem:[%s529_s1] sm:$0xff]  ;;  %v21_v5 = vld [vmem:[%s528_s0 + $0x30] sm:$0xff]  ;;  %v28_v6 = vld [vmem:[%s529_s1 + $0x28] sm:$0xf] }
   0x3   :  { %340 = vmatpush1.msk.msra.mxu0 %vm71_vm0, %v26_v1  ;;  %386 = vmatpush1.msk.msra.mxu1 %vm71_vm0, %v26_v1  ;;  %v15_v4 = vld [vmem:[%s528_s0] sm:$0xff] }
   0x4   :  { %111 = vmatprep.subr.mxu0 %v24_v2  ;;  %385 = vmatprep.subr.mxu1 %v24_v2 }
   0x5   :  { %112 = vmatpush1.msra.mxu0 %v23_v3  ;;  %387 = vmatpush1.msra.mxu1 %v23_v3 }
   0x6   :  { %8 = vsyncpa [#allocation3], 0  ;;  %341 = vmatmul.mubr.msk.f32.vlgmr.msra.gmra.mxu0 %vm46_vm1, %v15_v4  ;;  %347 = vmatmul.mubr.msk.f32.vlgmr.msra.gmra.mxu1 %vm46_vm1, %v21_v5  ;;  %v25_v8 = vld [vmem:[%s529_s1 + $0x10] sm:$0xff]  ;;  %v16_v9 = vld [vmem:[%s528_s0 + $0x8] sm:$0xff]  ;;  %v31_v15 = vlaneseq }
   0x7   :  { %368 = vmatprep.subr.msk.mxu1 %vm71_vm0, %v28_v6  ;;  %151 = vmatprep.mubr.f32.mxu0 %v414_v7  ;;  %v22_v10 = vld [vmem:[%s528_s0 + $0x38] sm:$0xff]  ;;  %v17_v11 = vld [vmem:[%s528_s0 + $0x10] sm:$0xff]  ;;  %v19_v13 = vld [vmem:[%s528_s0 + $0x20] sm:$0xff] }
   0x8   :  { %369 = vmatpush3.msk.msra.mxu1 %vm71_vm0, %v28_v6  ;;  %187 = vmatprep.mubr.f32.mxu1 %v414_v7  ;;  %v18_v12 = vld [vmem:[%s528_s0 + $0x18] sm:$0xff]  ;;  %v20_v14 = vld [vmem:[%s528_s0 + $0x28] sm:$0xff]  ;;  %v32_v16 = vshrl.u32 %v31_v15, 7  ;;  %v29_v18 = vld [vmem:[%s530_s2] sm:$0x7]  ;;  %s415_s0 = smov [#allocation2]  }
   0x9   :  { %370 = vmatprep.subr.mxu1 %v25_v8  ;;  %s328_s2 = sshll.u32 %s415_s0, 4  ;;  %s329_s2 = int_to_ptr.vmem [resolvable:$true] %s328_s2 }
   0xa   :  { %342 = vmatmul.mubr.msk.f32.gmra.mxu0 %vm46_vm1, %v16_v9  ;;  %348 = vmatmul.mubr.msk.f32.gmra.mxu1 %vm46_vm1, %v22_v10  ;;  %v33_v17 = vsub.s32 0, %v32_v16  ;;  %v37_v19 = vsub.s32 1, %v32_v16  ;;  %v41_v26 = vsub.s32 2, %v32_v16  ;;  %s392_s14 = scalar_lea.vmem %s329_s2, 3072  ;;  %p397_p1 = scmp.lt.s32.totalorder %s329_s2, %s329_s2 }
   0xb   :  { %371 = vmatpush3.msra.mxu1 %v25_v8  ;;  %157 = vmatprep.mubr.f32.mxu0 %v414_v7  ;;  %p393_p0 = scmp.ne.s32.totalorder %s329_s2, %s392_s14  ;;  %p398_p2 = scmp.lt.s32.totalorder %s392_s14, %s392_s14 }
   0xc   :  { %372 = vmatprep.mubr.msk.f32.mxu1 %vm46_vm1, %v15_v4  ;;  %v505_v20 = vrot.slane %v29_v18, %v33_v17  ;;  %v507_v21 = vrot.slane %v29_v18, %v37_v19  ;;  %v42_v35 = vrot.slane %v29_v18, %v41_v26 }
   0xd   :  { %p399_p3 = por %p398_p2, %p397_p1 }
   0xe   :  { %343 = vmatmul.mubr.msk.f32.gmra.mxu0 %vm46_vm1, %v17_v11  ;;  %373 = vmatmul.mubr.msk.f32.vlgmr.msra.gmra.mxu1 %vm46_vm1, %v16_v9 }
   0xf   :  { %163 = vmatprep.mubr.f32.mxu0 %v414_v7  ;;  %375 = vmatprep.mubr.msk.f32.mxu1 %vm46_vm1, %v17_v11  ;;  %p400_p4 = pnand %p399_p3, %p393_p0 }
  0x12   :  { %344 = vmatmul.mubr.msk.f32.gmra.mxu0 %vm46_vm1, %v18_v12  ;;  %376 = vmatmul.mubr.msk.f32.gmra.mxu1 %vm46_vm1, %v18_v12 }
  0x13   :  { %169 = vmatprep.mubr.f32.mxu0 %v414_v7  ;;  %378 = vmatprep.mubr.msk.f32.mxu1 %vm46_vm1, %v19_v13 }
  0x16   :  { %345 = vmatmul.mubr.msk.f32.gmra.mxu0 %vm46_vm1, %v19_v13  ;;  %379 = vmatmul.mubr.msk.f32.gmra.mxu1 %vm46_vm1, %v20_v14 }
  0x17   :  { %175 = vmatprep.mubr.f32.mxu0 %v414_v7  ;;  %381 = vmatprep.mubr.msk.f32.mxu1 %vm46_vm1, %v21_v5 }
  0x1a   :  { %346 = vmatmul.mubr.msk.f32.gmra.mxu0 %vm46_vm1, %v20_v14  ;;  %382 = vmatmul.mubr.msk.f32.gmra.mxu1 %vm46_vm1, %v22_v10 }
  0xc6   :  { %v147_v22 = vpop.f32.mrf.mxu0  ;;  %v183_v23 = vpop.f32.mrf.mxu1 }
  0xc7   :  { %v148_v24 = vadd.f32 %v147_v22, %v505_v20  ;;  %v184_v25 = vadd.f32 %v183_v23, %v505_v20 }
  0xc8   :  { %v149_v27 = vpop.f32.mrf.mxu0  ;;  %v185_v28 = vpop.f32.mrf.mxu1 }
  0xc9   :  { %299 = vst [vmem:[#allocation2] sm:$0xff] %v148_v24  ;;  %317 = vst [vmem:[#allocation2 + $0x90] sm:$0xff] %v184_v25  ;;  %v150_v29 = vadd.f32 %v149_v27, %v507_v21  ;;  %v186_v30 = vadd.f32 %v185_v28, %v507_v21 }
  0xca   :  { %v153_v31 = vpop.f32.mrf.mxu0  ;;  %v189_v32 = vpop.f32.mrf.mxu1 }
  0xcb   :  { %300 = vst [vmem:[#allocation2 + $0x8] sm:$0xff] %v150_v29  ;;  %318 = vst [vmem:[#allocation2 + $0x98] sm:$0xff] %v186_v30  ;;  %v154_v33 = vadd.f32 %v153_v31, %v505_v20  ;;  %v190_v34 = vadd.f32 %v189_v32, %v505_v20 }
  0xcc   :  { %v155_v36 = vpop.f32.mrf.mxu0  ;;  %v191_v37 = vpop.f32.mrf.mxu1 }
  0xcd   :  { %302 = vst [vmem:[#allocation2 + $0x18] sm:$0xff] %v154_v33  ;;  %320 = vst [vmem:[#allocation2 + $0xa8] sm:$0xff] %v190_v34  ;;  %v156_v38 = vadd.f32 %v155_v36, %v507_v21  ;;  %v192_v39 = vadd.f32 %v191_v37, %v507_v21 }
  0xce   :  { %v159_v40 = vpop.f32.mrf.mxu0  ;;  %v374_v41 = vpop.f32.mrf.mxu1 }
  0xcf   :  { %303 = vst [vmem:[#allocation2 + $0x20] sm:$0xff] %v156_v38  ;;  %321 = vst [vmem:[#allocation2 + $0xb0] sm:$0xff] %v192_v39  ;;  %v160_v42 = vadd.f32 %v159_v40, %v505_v20  ;;  %v266_v43 = vadd.f32 %v374_v41, %v42_v35 }
  0xd0   :  { %v161_v44 = vpop.f32.mrf.mxu0  ;;  %v260_v45 = vpop.f32.mrf.mxu1 }
  0xd1   :  { %305 = vst [vmem:[#allocation2 + $0x30] sm:$0xff] %v160_v42  ;;  %304 = vst [vmem:[#allocation2 + $0x28] sm:$0xff] %v266_v43  ;;  %v162_v46 = vadd.f32 %v161_v44, %v507_v21  ;;  %v261_v47 = vadd.f32 %v260_v45, %v42_v35 }
  0xd2   :  { %v165_v48 = vpop.f32.mrf.mxu0  ;;  %v377_v49 = vpop.f32.mrf.mxu1 }
  0xd3   :  { %306 = vst [vmem:[#allocation2 + $0x38] sm:$0xff] %v162_v46  ;;  %301 = vst [vmem:[#allocation2 + $0x10] sm:$0xff] %v261_v47  ;;  %v166_v50 = vadd.f32 %v165_v48, %v505_v20  ;;  %v276_v51 = vadd.f32 %v377_v49, %v42_v35 }
  0xd4   :  { %v167_v52 = vpop.f32.mrf.mxu0  ;;  %v270_v53 = vpop.f32.mrf.mxu1 }
  0xd5   :  { %308 = vst [vmem:[#allocation2 + $0x48] sm:$0xff] %v166_v50  ;;  %310 = vst [vmem:[#allocation2 + $0x58] sm:$0xff] %v276_v51  ;;  %v168_v54 = vadd.f32 %v167_v52, %v507_v21  ;;  %v271_v55 = vadd.f32 %v270_v53, %v42_v35 }
  0xd6   :  { %v171_v56 = vpop.f32.mrf.mxu0  ;;  %v380_v57 = vpop.f32.mrf.mxu1 }
  0xd7   :  { %309 = vst [vmem:[#allocation2 + $0x50] sm:$0xff] %v168_v54  ;;  %307 = vst [vmem:[#allocation2 + $0x40] sm:$0xff] %v271_v55  ;;  %v172_v58 = vadd.f32 %v171_v56, %v505_v20  ;;  %v286_v59 = vadd.f32 %v380_v57, %v42_v35 }
  0xd8   :  { %v173_v60 = vpop.f32.mrf.mxu0  ;;  %v280_v61 = vpop.f32.mrf.mxu1 }
  0xd9   :  { %311 = vst [vmem:[#allocation2 + $0x60] sm:$0xff] %v172_v58  ;;  %316 = vst [vmem:[#allocation2 + $0x88] sm:$0xff] %v286_v59  ;;  %v174_v62 = vadd.f32 %v173_v60, %v507_v21  ;;  %v281_v63 = vadd.f32 %v280_v61, %v42_v35 }
  0xda   :  { %v177_v0 = vpop.f32.mrf.mxu0  ;;  %v383_v1 = vpop.f32.mrf.mxu1 }
  0xdb   :  { %312 = vst [vmem:[#allocation2 + $0x68] sm:$0xff] %v174_v62  ;;  %313 = vst [vmem:[#allocation2 + $0x70] sm:$0xff] %v281_v63  ;;  %v178_v2 = vadd.f32 %v177_v0, %v505_v20  ;;  %v296_v3 = vadd.f32 %v383_v1, %v42_v35 }
  0xdc   :  { %v179_v4 = vpop.f32.mrf.mxu0  ;;  %v290_v5 = vpop.f32.mrf.mxu1 }
  0xdd   :  { %314 = vst [vmem:[#allocation2 + $0x78] sm:$0xff] %v178_v2  ;;  %322 = vst [vmem:[#allocation2 + $0xb8] sm:$0xff] %v296_v3  ;;  %v180_v6 = vadd.f32 %v179_v4, %v507_v21  ;;  %v291_v7 = vadd.f32 %v290_v5, %v42_v35 }
  0xdf   :  { %315 = vst [vmem:[#allocation2 + $0x80] sm:$0xff] %v180_v6  ;;  %319 = vst [vmem:[#allocation2 + $0xa0] sm:$0xff] %v291_v7 }
  0xe0   :  { %403 = shalt.err (!%p400_p4)
}
  0xe1   :  { %s416_s15 = smov 384   ;;  %s417_s16 = smov 24  }
  0xe2   :  { %334 = dma.vmem_to_hbm [thread:$0]  %s329_s2, 3072, %s531_s3, [#allocation3], %s416_s15, %s416_s15, %s417_s16  }
  0xe3   :  { %412 = dma.done.wait [#allocation3], 3072  }
  0xe4   :  { %413 = vsyncadd [#allocation3], 4294964224 }
  0xe5   :  { %338 = vsyncpa [#allocation3], 1 }

</bundles_post_ra>
